<compile_context>
chip_gen: v7x
topology: tpu7x:2x2x1
jax: 0.10.0
libtpu: 0.0.40
codegen_flags: <defaults>
</compile_context>

<pallas_src>
import math

import jax
import jax.numpy as jnp
from jax.experimental import pallas as pl
from jax.experimental.pallas import tpu as pltpu


_LANE = 128     # lane width: last-dim alignment (MXU / lane-dense stores)
_SUBLANE = 8    # sublane alignment for the second-to-last dim


def _round_up(n, m):
    return ((n + m - 1) // m) * m


def gate_kernel(x_ref, w1_ref, b1_ref, w2_ref, b2_ref, o_ref):
    """Fused Linear -> ReLU -> Linear -> Sigmoid -> *2 for one batch tile.

    x / W1 / W2 are bf16 (MXU-native); both matmuls accumulate in f32 and all
    post-matmul elementwise math stays in f32.
    """
    x = x_ref[...]                                                  # (TB, IN_P) bf16
    h = jnp.dot(x, w1_ref[...], preferred_element_type=jnp.float32)
    h = jnp.maximum(h + b1_ref[...], 0.0)                           # f32 epilogue
    z = jnp.dot(h.astype(w2_ref.dtype), w2_ref[...],
                preferred_element_type=jnp.float32) + b2_ref[...]
    # jax.nn.sigmoid lowers to EUP exp+reciprocal -> its own VLIW slot,
    # effectively free next to the MXU work.
    o_ref[...] = (jax.nn.sigmoid(z) * 2.0).astype(o_ref.dtype)


def _vmem_limit_bytes(tb, in_p, hid_p, out_p):
    """Conservative VMEM budget (assume double buffering for every operand),
    clamped to v7x's 64 MiB per-TensorCore VMEM."""
    x_bytes = 2 * tb * in_p * 2                        # bf16 input tile
    o_bytes = 2 * tb * out_p * 4                       # f32 output tile
    w_bytes = 2 * (in_p * hid_p + hid_p * out_p) * 2   # bf16 resident weights
    b_bytes = 2 * (hid_p + out_p) * 4                  # f32 biases
    scratch = tb * (hid_p + out_p) * 4                 # f32 intermediates h, z
    total = x_bytes + o_bytes + w_bytes + b_bytes + scratch
    return int(min(max(2 * total, 16 * 1024 * 1024), 64 * 1024 * 1024))


def gate_nn_forward(x, w1, b1, w2, b2, *, block_b=512):
    """sigmoid(relu(x @ w1 + b1) @ w2 + b2) * 2, fused in one Pallas kernel.

    x: (B, in_dim); w1: (in_dim, hid); b1: (1, hid); w2: (hid, out); b2: (1, out)
    """
    B, in_dim = x.shape
    hid_dim = w1.shape[1]
    out_dim = w2.shape[1]
    out_dtype = x.dtype

    # Pad every feature dim to a lane (128) multiple. Zero padding is exact:
    # zero contraction columns add nothing, relu(0+0)=0 kills padded hidden
    # units, and padded output columns are sliced off below.
    in_p = _round_up(in_dim, _LANE)
    hid_p = _round_up(hid_dim, _LANE)
    out_p = _round_up(out_dim, _LANE)

    # Batch tile: sublane-aligned, capped by the (padded) batch and block_b.
    tb = min(_round_up(block_b, _SUBLANE), _round_up(B, _SUBLANE))
    b_p = _round_up(B, tb)
    num_b_tiles = b_p // tb

    # bf16 matmul operands, f32 biases.
    xp = jnp.zeros((b_p, in_p), jnp.bfloat16).at[:B, :in_dim].set(
        x.astype(jnp.bfloat16))
    w1p = jnp.zeros((in_p, hid_p), jnp.bfloat16).at[:in_dim, :hid_dim].set(
        w1.astype(jnp.bfloat16))
    w2p = jnp.zeros((hid_p, out_p), jnp.bfloat16).at[:hid_dim, :out_dim].set(
        w2.astype(jnp.bfloat16))
    b1p = jnp.zeros((1, hid_p), jnp.float32).at[:, :hid_dim].set(
        b1.astype(jnp.float32))
    b2p = jnp.zeros((1, out_p), jnp.float32).at[:, :out_dim].set(
        b2.astype(jnp.float32))

    out_padded = pl.pallas_call(
        gate_kernel,
        out_shape=jax.ShapeDtypeStruct((b_p, out_p), out_dtype),
        grid=(num_b_tiles,),
        in_specs=[
            pl.BlockSpec((tb, in_p), lambda i: (i, 0)),      # streamed per tile
            pl.BlockSpec((in_p, hid_p), lambda i: (0, 0)),   # weights resident
            pl.BlockSpec((1, hid_p), lambda i: (0, 0)),      # across grid steps
            pl.BlockSpec((hid_p, out_p), lambda i: (0, 0)),  # (constant index ->
            pl.BlockSpec((1, out_p), lambda i: (0, 0)),      #  DMA'd only once)
        ],
        out_specs=pl.BlockSpec((tb, out_p), lambda i: (i, 0)),
        compiler_params=pltpu.CompilerParams(
            # Batch tiles are independent -> megacore-shardable on v7x.
            dimension_semantics=("parallel",),
            vmem_limit_bytes=_vmem_limit_bytes(tb, in_p, hid_p, out_p),
        ),
    )(xp, w1p, b1p, w2p, b2p)

    return out_padded[:B, :out_dim]


def init_params(key, input_dim, hidden_dim, output_dim, dtype=jnp.float32):
    """Deterministic parameter init mirroring the PyTorch module's init scheme."""
    k1, k2, k3, k4 = jax.random.split(key, 4)

    # lin1: xavier_uniform on weight [hidden, input]; stored transposed [input, hidden]
    limit1 = math.sqrt(6.0 / (input_dim + hidden_dim))
    w1 = jax.random.uniform(k1, (input_dim, hidden_dim), dtype,
                            minval=-limit1, maxval=limit1)
    # lin1 bias: PyTorch default U(-1/sqrt(fan_in), 1/sqrt(fan_in))
    bb1 = 1.0 / math.sqrt(input_dim)
    b1 = jax.random.uniform(k2, (1, hidden_dim), dtype, minval=-bb1, maxval=bb1)

    # lin2: kaiming_uniform (fan_in, relu): bound = sqrt(6 / fan_in)
    limit2 = math.sqrt(6.0 / hidden_dim)
    w2 = jax.random.uniform(k3, (hidden_dim, output_dim), dtype,
                            minval=-limit2, maxval=limit2)
    bb2 = 1.0 / math.sqrt(hidden_dim)
    b2 = jax.random.uniform(k4, (1, output_dim), dtype, minval=-bb2, maxval=bb2)

    return w1, b1, w2, b2


if __name__ == "__main__":
    key = jax.random.PRNGKey(0)
    kx, kp = jax.random.split(key)

    batch = 16
    input_dim = 32
    hidden_dim = 32
    output_dim = 32

    x = jax.random.normal(kx, (batch, input_dim), jnp.float32)
    w1, b1, w2, b2 = init_params(kp, input_dim, hidden_dim, output_dim)

    # block_b=8 -> grid=(2,): the demo exercises the batch-tiled, parallel
    # path; production callers keep the default 512-row tile.
    out = gate_nn_forward(x, w1, b1, w2, b2, block_b=8)
    out = jax.block_until_ready(out)
    assert out.shape == (batch, output_dim)

    # Reference 1: identical bf16-input / f32-accumulate math in plain JAX.
    xb = x.astype(jnp.bfloat16)
    w1b = w1.astype(jnp.bfloat16)
    w2b = w2.astype(jnp.bfloat16)
    h = jnp.maximum(jnp.dot(xb, w1b, preferred_element_type=jnp.float32) + b1, 0.0)
    ref_bf16 = jax.nn.sigmoid(
        jnp.dot(h.astype(jnp.bfloat16), w2b,
                preferred_element_type=jnp.float32) + b2) * 2.0
    assert jnp.allclose(out, ref_bf16, atol=1e-4, rtol=1e-4)

    # Reference 2: full-f32 PyTorch-equivalent math (loose tol for bf16 matmuls).
    h32 = jnp.maximum(x @ w1 + b1, 0.0)
    ref_f32 = jax.nn.sigmoid(h32 @ w2 + b2) * 2.0
    assert jnp.allclose(out, ref_f32, atol=5e-2, rtol=5e-2)

    print("KERNEL_OK")
</pallas_src>

<mosaic_0001>
module attributes {stable_mosaic.version = 11 : i64} {
  func.func @gate_kernel(%arg0: i32, %arg1: memref<8x128xbf16, #tpu.memory_space<vmem>>, %arg2: memref<128x128xbf16, #tpu.memory_space<vmem>>, %arg3: memref<1x128xf32, #tpu.memory_space<vmem>>, %arg4: memref<128x128xbf16, #tpu.memory_space<vmem>>, %arg5: memref<1x128xf32, #tpu.memory_space<vmem>>, %arg6: memref<8x128xf32, #tpu.memory_space<vmem>>) attributes {dimension_semantics = [#tpu.dimension_semantics<parallel>], iteration_bounds = array<i64: 2>, scalar_prefetch = 0 : i64, scratch_operands = 0 : i64, tpu.core_type = #tpu.core_type<tc>, window_params = [{transform_indices = @transform_0, window_bounds = array<i64: 8, 128>}, {pipeline_mode = #tpu.pipeline_mode<synchronous>, transform_indices = @transform_1, window_bounds = array<i64: 128, 128>}, {pipeline_mode = #tpu.pipeline_mode<synchronous>, transform_indices = @transform_2, window_bounds = array<i64: 1, 128>}, {pipeline_mode = #tpu.pipeline_mode<synchronous>, transform_indices = @transform_3, window_bounds = array<i64: 128, 128>}, {pipeline_mode = #tpu.pipeline_mode<synchronous>, transform_indices = @transform_4, window_bounds = array<i64: 1, 128>}, {transform_indices = @transform_5, window_bounds = array<i64: 8, 128>}]} {
    %c0 = arith.constant 0 : index
    %c0_0 = arith.constant 0 : index
    %0 = vector.load %arg1[%c0, %c0_0] : memref<8x128xbf16, #tpu.memory_space<vmem>>, vector<8x128xbf16>
    %c0_1 = arith.constant 0 : index
    %c0_2 = arith.constant 0 : index
    %1 = vector.load %arg2[%c0_1, %c0_2] : memref<128x128xbf16, #tpu.memory_space<vmem>>, vector<128x128xbf16>
    %cst = arith.constant dense<0.000000e+00> : vector<8x128xf32>
    %2 = tpu.matmul %0, %1, %cst {dimension_numbers = #tpu.dot_dimension_numbers<[1], [0], [0], [1], [0, 0, 1, 1], [], []>} : vector<8x128xbf16>, vector<128x128xbf16>, vector<8x128xf32> -> vector<8x128xf32>
    %c0_3 = arith.constant 0 : index
    %c0_4 = arith.constant 0 : index
    %3 = vector.load %arg3[%c0_3, %c0_4] : memref<1x128xf32, #tpu.memory_space<vmem>>, vector<1x128xf32>
    %4 = vector.broadcast %3 : vector<1x128xf32> to vector<8x128xf32>
    %5 = arith.addf %2, %4 : vector<8x128xf32>
    %cst_5 = arith.constant 0.000000e+00 : f32
    %6 = vector.broadcast %cst_5 : f32 to vector<8x128xf32>
    %7 = arith.maximumf %5, %6 : vector<8x128xf32>
    %8 = arith.truncf %7 : vector<8x128xf32> to vector<8x128xbf16>
    %c0_6 = arith.constant 0 : index
    %c0_7 = arith.constant 0 : index
    %9 = vector.load %arg4[%c0_6, %c0_7] : memref<128x128xbf16, #tpu.memory_space<vmem>>, vector<128x128xbf16>
    %cst_8 = arith.constant dense<0.000000e+00> : vector<8x128xf32>
    %10 = tpu.matmul %8, %9, %cst_8 {dimension_numbers = #tpu.dot_dimension_numbers<[1], [0], [0], [1], [0, 0, 1, 1], [], []>} : vector<8x128xbf16>, vector<128x128xbf16>, vector<8x128xf32> -> vector<8x128xf32>
    %c0_9 = arith.constant 0 : index
    %c0_10 = arith.constant 0 : index
    %11 = vector.load %arg5[%c0_9, %c0_10] : memref<1x128xf32, #tpu.memory_space<vmem>>, vector<1x128xf32>
    %12 = vector.broadcast %11 : vector<1x128xf32> to vector<8x128xf32>
    %13 = arith.addf %10, %12 : vector<8x128xf32>
    %14 = arith.negf %13 : vector<8x128xf32>
    %15 = math.exp %14 : vector<8x128xf32>
    %cst_11 = arith.constant 1.000000e+00 : f32
    %16 = vector.broadcast %cst_11 : f32 to vector<8x128xf32>
    %17 = arith.addf %16, %15 : vector<8x128xf32>
    %18 = arith.divf %16, %17 : vector<8x128xf32>
    %cst_12 = arith.constant 2.000000e+00 : f32
    %19 = vector.broadcast %cst_12 : f32 to vector<8x128xf32>
    %20 = arith.mulf %18, %19 : vector<8x128xf32>
    %c0_13 = arith.constant 0 : index
    %c0_14 = arith.constant 0 : index
    %21 = vector.load %arg6[%c0_13, %c0_14] : memref<8x128xf32, #tpu.memory_space<vmem>>, vector<8x128xf32>
    tpu.vector_store %arg6[%c0_13, %c0_14], %20 {strides = array<i32>} : memref<8x128xf32, #tpu.memory_space<vmem>>, vector<8x128xf32>,
    return
  }
  func.func @transform_0(%arg0: i32) -> (i32, i32) {
    %c0_i32 = arith.constant 0 : i32
    %c0_i32_0 = arith.constant 0 : i32
    return %arg0, %c0_i32 : i32, i32
  }
  func.func @transform_1(%arg0: i32) -> (i32, i32) {
    %c0_i32 = arith.constant 0 : i32
    %c0_i32_0 = arith.constant 0 : i32
    %c0_i32_1 = arith.constant 0 : i32
    return %c0_i32, %c0_i32_0 : i32, i32
  }
  func.func @transform_2(%arg0: i32) -> (i32, i32) {
    %c0_i32 = arith.constant 0 : i32
    %c0_i32_0 = arith.constant 0 : i32
    %c0_i32_1 = arith.constant 0 : i32
    return %c0_i32, %c0_i32_0 : i32, i32
  }
  func.func @transform_3(%arg0: i32) -> (i32, i32) {
    %c0_i32 = arith.constant 0 : i32
    %c0_i32_0 = arith.constant 0 : i32
    %c0_i32_1 = arith.constant 0 : i32
    return %c0_i32, %c0_i32_0 : i32, i32
  }
  func.func @transform_4(%arg0: i32) -> (i32, i32) {
    %c0_i32 = arith.constant 0 : i32
    %c0_i32_0 = arith.constant 0 : i32
    %c0_i32_1 = arith.constant 0 : i32
    return %c0_i32, %c0_i32_0 : i32, i32
  }
  func.func @transform_5(%arg0: i32) -> (i32, i32) {
    %c0_i32 = arith.constant 0 : i32
    %c0_i32_0 = arith.constant 0 : i32
    return %arg0, %c0_i32 : i32, i32
  }
}

</mosaic_0001>

<bundles_post_ra>
// kernel: tpu_custom_call.1
= control target key start
LH: loop header
LB: loop body
LE: loop exit
PB: predicated region body
PF: predicated region fallthrough
CT: control target
= control target key end

     0   :  { %10 = vsyncpa [#allocation3], 0  ;;  %s1225_s0 = inlined_call_operand.hbm [shape: bf16[16,128], index: 0, kind: input, shape index: {}]   ;;  %s1226_s1 = inlined_call_operand.hbm [shape: bf16[128,128], index: 1, kind: input, shape index: {}]   ;;  %s1227_s2 = inlined_call_operand.vmem [shape: f32[1,128], index: 2, kind: input, shape index: {}]   ;;  %s1228_s3 = inlined_call_operand.hbm [shape: bf16[128,128], index: 3, kind: input, shape index: {}]   ;;  %s1229_s4 = inlined_call_operand.vmem [shape: f32[1,128], index: 4, kind: input, shape index: {}]   ;;  %s1230_s5 = inlined_call_operand.hbm [shape: f32[16,128], index: 5, kind: output, shape index: {}]  }
   0x1   :  { %12 = vsyncpa [#allocation3 + $0x1], 0 }
   0x2   :  { %13 = vsyncpa [#allocation6], 0 }
   0x3   :  { %14 = vsyncpa [#allocation4], 0 }
   0x4   :  { %16 = vsyncpa [#allocation4 + $0x1], 0  ;;  %s986_s18 = smov 0   ;;  %s988_s19 = smov 0  }
   0x5   :  { %s990_s20 = smov 0   ;;  %s992_s21 = smov 0  }
   0x6 LB: > { %s1007_s22 = sadd.s32 4294967295, %s946_s21   ;;  %s606_s23 = sadd.s32 4294967294, %s946_s21   ;;  %s946_s21 = sphi %s992_s21, %s1250_s21   ;;  %s942_s20 = sphi %s990_s20, %s1249_s20   ;;  %s938_s19 = sphi %s988_s19, %s1248_s19   ;;  %s934_s18 = sphi %s986_s18, %s1247_s18  }
   0x7   : > { %p42_p0 = scmp.ne.s32.totalorder %s938_s19, %s934_s18  ;;  %p1231_p1 = scmp.eq.s32.totalorder %s1007_s22, 0 }
   0x8   : > { %p156_p3 = scmp.eq.s32.totalorder %s606_s23, 1  ;;  %p607_p5 = scmp.ge.s32.totalorder %s946_s21, 1 }
   0x9   : > { %p1016_p4 = por %p1231_p1, %p42_p0  ;;  %p163_p7 = scmp.lt.s32.totalorder %s946_s21, 3 }
   0xa   : > { %p1021_p6 = por %p156_p3, %p42_p0  ;;  %s948_s27 = smov [#allocation5]  }
   0xb   : > { %s1234_s24 = scalar_select %p1016_p4, 1, 0 }
   0xc   : > { %s1235_s25 = scalar_select %p1021_p6, 1, 0 }
   0xd   : > { %p1026_p8 = pnand %p607_p5, %p163_p7  ;;  %s175_s28 = sshll.u32 %s948_s27, 4  ;;  %s1030_s28 = int_to_ptr.vmem [resolvable:$true] %s175_s28 }
   0xe   : > { %s949_s30 = smov [#allocation7]   ;;  %s790_s9 = scalar_lea.hbm %s1226_s1, 1024 }
   0xf   : > { %p711_p9 = pneg %p1026_p8  ;;  %s191_s6 = sshll.u32 %s949_s30, 4  ;;  %s1041_s6 = int_to_ptr.vmem [resolvable:$true] %s191_s6 }
  0x10   : > { %p791_p12 = scmp.ne.s32.totalorder %s1226_s1, %s790_s9  ;;  %p797_p5 = scmp.lt.u32.totalorder %s790_s9, %s1226_s1 }
  0x11   : > { %p1037_p11 = pnand %p711_p9, %p1231_p1 }
  0x13   : > { %p792_p13 = pneg %p1037_p11 }
  0x15   : > { %p793_p0 = pnand %p792_p13, %p791_p12 }
  0x17   : > { %p794_p3 = pneg %p793_p0 }
  0x19   : > { %p799_p7 = pnand %p797_p5, %p794_p3 }
  0x1b   : > { %802 = shalt.err (!%p799_p7)
}
  0x1c   : > { %s803_s14 = scalar_lea.vmem %s1030_s28, 1024  ;;  %p811_p2 = scmp.lt.s32.totalorder %s1030_s28, %s1030_s28 }
  0x1d   : > { %p804_p9 = scmp.ne.s32.totalorder %s1030_s28, %s803_s14  ;;  %p812_p12 = scmp.lt.s32.totalorder %s803_s14, %s803_s14 }
  0x1f   : > { %p806_p10 = pnand %p804_p9, %p792_p13  ;;  %p813_p0 = por %p812_p12, %p811_p2 }
  0x21   : > { %p807_p1 = pneg %p806_p10 }
  0x23   : > { %p814_p6 = pnand %p813_p0, %p807_p1 }
  0x25   : > { %817 = shalt.err (!%p814_p6)
}
  0x26   : > { %s950_s15 = smov 64   ;;  %s951_s16 = smov 4  }
  0x27   : > { %714 = dma.hbm_to_vmem [thread:$0]  (!%p1037_p11), %s1226_s1, 1024, %s1030_s28, [#allocation6], %s950_s15, %s950_s15, %s951_s16  }
  0x28   : > { %s818_s7 = scalar_lea.hbm %s1228_s3, 1024 }
  0x29   : > { %p819_p2 = scmp.ne.s32.totalorder %s1228_s3, %s818_s7  ;;  %p825_p10 = scmp.lt.u32.totalorder %s818_s7, %s1228_s3 }
  0x2b   : > { %p821_p1 = pnand %p819_p2, %p792_p13 }
  0x2d   : > { %p822_p6 = pneg %p821_p1 }
  0x2f   : > { %p827_p3 = pnand %p825_p10, %p822_p6 }
  0x31   : > { %830 = shalt.err (!%p827_p3)
}
  0x32   : > { %s831_s28 = scalar_lea.vmem %s1041_s6, 1024  ;;  %p839_p12 = scmp.lt.s32.totalorder %s1041_s6, %s1041_s6 }
  0x33   : > { %p832_p5 = scmp.ne.s32.totalorder %s1041_s6, %s831_s28  ;;  %p840_p0 = scmp.lt.s32.totalorder %s831_s28, %s831_s28 }
  0x35   : > { %p834_p7 = pnand %p832_p5, %p792_p13  ;;  %p841_p2 = por %p840_p0, %p839_p12 }
  0x37   : > { %p835_p9 = pneg %p834_p7 }
  0x39   : > { %p842_p1 = pnand %p841_p2, %p835_p9 }
  0x3b   : > { %845 = shalt.err (!%p842_p1)
}
  0x3c   : > { %717 = dma.hbm_to_vmem [thread:$0]  (!%p1037_p11), %s1228_s3, 1024, %s1041_s6, [#allocation6], %s950_s15, %s950_s15, %s951_s16  }
  0x3d   : > { %s1096_s14 = sadd.s32 1, %s946_s21   ;;  %s29_s29 = sadd.s32 1, %s942_s20 }
  0x3e   : > { %s26_s17 = ssub.s32 %s946_s21, %s1096_s14  ;;  %p36_p13 = scmp.ne.s32.totalorder %s942_s20, %s938_s19 }
  0x3f   : > { %p27_p6 = scmp.eq.s32.totalorder %s26_s17, 0  ;;  %p37_p10 = scmp.eq.s32.totalorder %s946_s21, 0 }
  0x40   : > { %p1238_p3 = scmp.eq.s32.totalorder %s1007_s22, 1  ;;  %p728_p7 = scmp.lt.s32.totalorder %s946_s21, 2 }
  0x41   : > { %s1112_s27 = scalar_select %p27_p6, %s942_s20, %s29_s29  }
  0x42   : > { %p1106_p5 = por %p1238_p3, %p36_p13  ;;  %p38_p9 = por %p37_p10, %p36_p13 }
  0x43   : > { %s208_s30 = sand.u32 1, %s942_s20   ;;  %s612_s6 = sshll.u32 %s946_s21, 6 }
  0x44   : > { %s1239_s23 = scalar_select %p1106_p5, 1, 0 }
  0x45   : > { %s611_s7 = sshll.u32 %s208_s30, 2  ;;  %s1119_s8 = scalar_lea.hbm %s1225_s0, %s612_s6 }
  0x46   : > { %s212_s9 = scalar_lea.vmem [#allocation2], %s611_s7  ;;  %p1123_p11 = pnand %p728_p7, %p38_p9 }
  0x47   : > { %s219_s10 = sshll.u32 %s212_s9, 4  ;;  %s209_s28 = scalar_lea.sflag [#allocation3], %s208_s30  ;;  %s1121_s10 = int_to_ptr.vmem [resolvable:$true] %s219_s10 }
  0x48   : > { %s846_s12 = scalar_lea.hbm %s1119_s8, 64  ;;  %p848_p0 = pneg %p1123_p11 }
  0x49   : > { %p847_p12 = scmp.ne.s32.totalorder %s1119_s8, %s846_s12  ;;  %s851_s17 = scalar_lea.hbm %s1225_s0, 128 }
  0x4a   : > { %p852_p13 = scmp.lt.u32.totalorder %s1119_s8, %s1225_s0  ;;  %p853_p6 = scmp.lt.u32.totalorder %s851_s17, %s846_s12 }
  0x4b   : > { %p849_p2 = pnand %p848_p0, %p847_p12  ;;  %p855_p3 = scmp.lt.u32.totalorder %s846_s12, %s1119_s8 }
  0x4c   : > { %p854_p10 = por %p853_p6, %p852_p13 }
  0x4d   : > { %p850_p1 = pneg %p849_p2 }
  0x4e   : > { %p856_p7 = por %p855_p3, %p854_p10 }
  0x50   : > { %p857_p9 = pnand %p856_p7, %p850_p1 }
  0x52   : > { %860 = shalt.err (!%p857_p9)
}
  0x53   : > { %s861_s30 = scalar_lea.vmem %s1121_s10, 64  ;;  %s952_s15 = smov [#allocation2]  }
  0x54   : > { %p862_p12 = scmp.ne.s32.totalorder %s1121_s10, %s861_s30  ;;  %s866_s16 = sshll.u32 %s952_s15, 4  ;;  %s867_s16 = int_to_ptr.vmem [resolvable:$false] %s866_s16 }
  0x55   : > { %s868_s9 = scalar_lea.vmem %s867_s16, 128  ;;  %p869_p4 = scmp.lt.s32.totalorder %s1121_s10, %s867_s16 }
  0x56   : > { %p864_p2 = pnand %p862_p12, %p848_p0  ;;  %p870_p13 = scmp.lt.s32.totalorder %s868_s9, %s861_s30 }
  0x58   : > { %p865_p5 = pneg %p864_p2  ;;  %p871_p6 = por %p870_p13, %p869_p4 }
  0x5a   : > { %p872_p10 = pnand %p871_p6, %p865_p5 }
  0x5c   : > { %875 = shalt.err (!%p872_p10)
}
  0x5d   : > { %721 = dma.hbm_to_vmem [thread:$0]  (!%p1123_p11), %s1119_s8, 64, %s1121_s10, %s209_s28  }
  0x5e   : > { %228 = sbr.rel (%p1026_p8) target bundleno = 613 (0x265), region = 40  ;;  %s1155_s12 = sand.u32 (!%p1026_p8), 1, %s938_s19  }
  0x5f   : > { %s614_s13 = sshll.u32 (!%p1026_p8), %s1155_s12, 2  ;;  %s231_s29 = scalar_lea.sflag (!%p1026_p8), [#allocation3], %s1155_s12 }
  0x60   : > { %s1159_s17 = scalar_lea.vmem (!%p1026_p8), [#allocation2], %s614_s13  ;;  %p1241_p4 = scmp.ne.s32.totalorder (!%p1026_p8), %s1234_s24, 0 }
  0x65   : > { %921 = dma.done.wait (%p1241_p4), %s231_s29, 64  }
  0x66   : > { %923 = vsyncadd (%p1241_p4), %s231_s29, 4294967232  ;;  %p1242_p5 = scmp.eq.s32.totalorder %s1007_s22, 0 }
  0x68   : > { %925 = dma.done.wait (%p1242_p5), [#allocation6], 2048   ;;  %p1243_p8 = pmov %p1242_p5 }
  0x69   : > { %v953_v0 = vmov 0.0   ;;  %vm954_vm0 = vmmov 0   ;;  %v770_v1 = vld [vmem:[#allocation5] sm:$0xff]   ;;  %v771_v2 = vld [vmem:[#allocation5 + $0x8] sm:$0xff]   ;;  %v772_v3 = vld [vmem:[#allocation5 + $0x10] sm:$0xff]   ;;  %s617_s11 = sshll.u32 %s1155_s12, 3 }
  0x6a   : > { %927 = vsyncadd (%p1243_p8), [#allocation6], 4294965248  ;;  %659 = vmatprep.subr.bf16.mxu0 %v953_v0  ;;  %675 = vmatprep.mubr.msk.bf16.mxu0 %vm954_vm0, %v953_v0  ;;  %v778_v4 = vld [vmem:[#allocation7] sm:$0xff]   ;;  %v773_v5 = vld [vmem:[#allocation5 + $0x18] sm:$0xff]   ;;  %s638_s28 = sshll.u32 %s1007_s22, 7  ;;  %s268_s7 = scalar_lea.vmem [#allocation8], %s617_s11 }
  0x6b   : > { %679 = vmatprep.subr.bf16.mxu1 %v953_v0  ;;  %695 = vmatprep.mubr.msk.bf16.mxu1 %vm954_vm0, %v953_v0  ;;  %v779_v6 = vld [vmem:[#allocation7 + $0x8] sm:$0xff]   ;;  %v774_v7 = vld [vmem:[#allocation5 + $0x20] sm:$0xff]   ;;  %v780_v8 = vld [vmem:[#allocation7 + $0x10] sm:$0xff]   ;;  %s517_s6 = sshll.u32 %s268_s7, 4  ;;  %s1181_s16 = scalar_lea.hbm %s1230_s5, %s638_s28  ;;  %s1183_s6 = int_to_ptr.vmem [resolvable:$true] %s517_s6 }
  0x6c   : > { %660 = vmatpush3.bf16.msra.mxu0 %v770_v1  ;;  %680 = vmatpush3.bf16.msra.mxu1 %v778_v4  ;;  %v775_v9 = vld [vmem:[#allocation5 + $0x28] sm:$0xff]   ;;  %v781_v10 = vld [vmem:[#allocation7 + $0x18] sm:$0xff]   ;;  %v776_v11 = vld [vmem:[#allocation5 + $0x30] sm:$0xff]   ;;  %s504_s9 = scalar_lea.sflag [#allocation4], %s1155_s12  ;;  %s876_s13 = scalar_lea.vmem %s1183_s6, 128 }
  0x6d   : > { %661 = vmatprep.subr.bf16.mxu0 %v953_v0  ;;  %681 = vmatprep.subr.bf16.mxu1 %v953_v0  ;;  %v782_v12 = vld [vmem:[#allocation7 + $0x20] sm:$0xff]   ;;  %v777_v13 = vld [vmem:[#allocation5 + $0x38] sm:$0xff]   ;;  %v783_v14 = vld [vmem:[#allocation7 + $0x28] sm:$0xff]   ;;  %p877_p11 = scmp.ne.s32.totalorder %s1183_s6, %s876_s13  ;;  %p1244_p0 = scmp.ne.s32.totalorder %s1239_s23, 0 }
  0x6e   : > { %v270_v15 = vld [vmem:[%s1159_s17] sm:$0xf]  ;;  %v784_v16 = vld [vmem:[#allocation7 + $0x30] sm:$0xff]   ;;  %s955_s22 = smov [#allocation8]  }
  0x6f   : > { %v785_v17 = vld [vmem:[#allocation7 + $0x38] sm:$0xff]   ;;  %p878_p1 = pnand %p877_p11, %p1244_p0  ;;  %s880_s29 = sshll.u32 %s955_s22, 4  ;;  %s881_s29 = int_to_ptr.vmem [resolvable:$false] %s880_s29 }
  0x70   : > { %662 = vmatpush3.bf16.msra.mxu0 %v771_v2  ;;  %682 = vmatpush3.bf16.msra.mxu1 %v779_v6  ;;  %v618_v18 = vld [vmem:[%s1227_s2] ss:$0 sm:$0xff]  ;;  %s882_s17 = scalar_lea.vmem %s881_s29, 256  ;;  %p883_p7 = scmp.lt.s32.totalorder %s1183_s6, %s881_s29 }
  0x71   : > { %663 = vmatprep.subr.bf16.mxu0 %v953_v0  ;;  %683 = vmatprep.subr.bf16.mxu1 %v953_v0  ;;  %v627_v26 = vld [vmem:[%s1229_s4] ss:$0 sm:$0xff]  ;;  %p879_p3 = pneg %p878_p1  ;;  %p884_p9 = scmp.lt.s32.totalorder %s882_s17, %s876_s13 }
  0x73   : > { %p885_p12 = por %p884_p9, %p883_p7 }
  0x74   : > { %664 = vmatpush3.bf16.msra.mxu0 %v772_v3  ;;  %684 = vmatpush3.bf16.msra.mxu1 %v780_v8 }
  0x75   : > { %665 = vmatprep.subr.bf16.mxu0 %v953_v0  ;;  %685 = vmatprep.subr.bf16.mxu1 %v953_v0  ;;  %p886_p2 = pnand %p885_p12, %p879_p3 }
  0x78   : > { %666 = vmatpush3.bf16.msra.mxu0 %v773_v5  ;;  %686 = vmatpush3.bf16.msra.mxu1 %v781_v10 }
  0x79   : > { %667 = vmatprep.subr.bf16.mxu0 %v953_v0  ;;  %687 = vmatprep.subr.bf16.mxu1 %v953_v0 }
  0x7c   : > { %668 = vmatpush3.bf16.msra.mxu0 %v774_v7  ;;  %688 = vmatpush3.bf16.msra.mxu1 %v782_v12 }
  0x7d   : > { %669 = vmatprep.subr.bf16.mxu0 %v953_v0  ;;  %689 = vmatprep.subr.bf16.mxu1 %v953_v0 }
  0x80   : > { %670 = vmatpush3.bf16.msra.mxu0 %v775_v9  ;;  %690 = vmatpush3.bf16.msra.mxu1 %v783_v14 }
  0x81   : > { %671 = vmatprep.subr.bf16.mxu0 %v953_v0  ;;  %691 = vmatprep.subr.bf16.mxu1 %v953_v0 }
  0x84   : > { %672 = vmatpush3.bf16.msra.mxu0 %v776_v11  ;;  %692 = vmatpush3.bf16.msra.mxu1 %v784_v16 }
  0x85   : > { %673 = vmatprep.subr.bf16.mxu0 %v953_v0  ;;  %693 = vmatprep.subr.bf16.mxu1 %v953_v0 }
  0x88   : > { %674 = vmatpush3.bf16.msra.mxu0 %v777_v13  ;;  %694 = vmatpush3.bf16.msra.mxu1 %v785_v17 }
  0x8b   : > { %676 = vmatmul.mubr.bf16.vlgmr.msra.gmra.mrb[0].mxu0 %v270_v15 }
 0x15e   : > { %v376_v19 = vpop.f32.mrb[0].mxu0 }
 0x15f   : > { %v377_v20 = vadd.f32 %v618_v18, %v376_v19  ;;  %v677_v21 = vpop.f32.mrb[1].mxu0 }
 0x160   : > { %v379_v22 = vpop.f32.mrb[2].mxu0 }
 0x161   : > { %v382_v23 = vmax.f32 %v377_v20, 0.0  ;;  %v678_v24 = vpop.f32.mrb[3].mxu0 }
 0x163   : > { %v383_v25 = vpack.c.bf16 %v382_v23, %v382_v23 }
 0x165   : > { %696 = vmatmul.mubr.bf16.vlgmr.msra.gmra.mrb[0].mxu1 %v383_v25 }
 0x238   : > { %v489_v27 = vpop.f32.mrb[0].mxu1 }
 0x239   : > { %v490_v28 = vadd.f32 %v627_v26, %v489_v27  ;;  %v697_v29 = vpop.f32.mrb[1].mxu1 }
 0x23a   : > { %v492_v30 = vpop.f32.mrb[2].mxu1 }
 0x23b   : > { %v636_v31 = vmul.f32 -1.442695, %v490_v28  ;;  %v698_v32 = vpop.f32.mrb[3].mxu1 }
 0x23d   : > { %786 = vpow2.f32 %v636_v31 }
 0x247   : > { %v787_v33 = vpop.eup %786 }
 0x248   : > { %v498_v34 = vadd.f32 1.0, %v787_v33 }
 0x24a   : > { %788 = vrcp.f32 %v498_v34 }
 0x254   : > { %v789_v35 = vpop.eup %788 }
 0x255   : > { %v501_v36 = vmul.f32 2.0, %v789_v35 }
 0x257   : > { %502 = vst [vmem:[%s268_s7] sm:$0xff] %v501_v36 }
 0x258   : > { %889 = shalt.err (!%p886_p2)
}
 0x259   : > { %s890_s12 = scalar_lea.hbm %s1181_s16, 128  ;;  %s894_s8 = scalar_lea.hbm %s1230_s5, 256 }
 0x25a   : > { %p891_p13 = scmp.ne.s32.totalorder %s1181_s16, %s890_s12  ;;  %p895_p4 = scmp.lt.u32.totalorder %s1181_s16, %s1230_s5 }
 0x25b   : > { %p896_p5 = scmp.lt.u32.totalorder %s894_s8, %s890_s12  ;;  %p898_p11 = scmp.lt.u32.totalorder %s890_s12, %s1181_s16 }
 0x25c   : > { %p892_p6 = pnand %p891_p13, %p1244_p0 }
 0x25d   : > { %p897_p8 = por %p896_p5, %p895_p4 }
 0x25e   : > { %p893_p10 = pneg %p892_p6 }
 0x25f   : > { %p899_p1 = por %p898_p11, %p897_p8 }
 0x261   : > { %p900_p3 = pnand %p899_p1, %p893_p10 }
 0x263   : > { %903 = shalt.err (!%p900_p3)
}
 0x264   : > { %709 = dma.vmem_to_hbm [thread:$0]  (%p1244_p0), %s1183_s6, 128, %s1181_s16, %s504_s9  }
 0x265 PF: > { %s529_s28 = sand.u32 1, %s934_s18   ;;  %p1245_p7 = scmp.ne.s32.totalorder %s1235_s25, 0 }
 0x266   : > { %p1246_p9 = scmp.ge.s32.totalorder %s946_s21, 2  ;;  %s530_s7 = scalar_lea.sflag [#allocation4], %s529_s28 }
 0x268   : > { %p723_p12 = pnand %p1246_p9, %p1245_p7 }
 0x26a   : > { %929 = dma.done.wait (!%p723_p12), %s530_s7, 128  }
 0x26b   : > { %931 = vsyncadd (!%p723_p12), %s530_s7, 4294967168  ;;  %p19_p2 = scmp.ge.s32.totalorder %s1096_s14, 4   ;;  %s1247_s18 = smov %s938_s19 }
 0x26c   : > { %s1248_s19 = smov %s942_s20  ;;  %s1249_s20 = smov %s1112_s27 }
 0x26d   : > { %s1250_s21 = smov %s1096_s14  ;;  %21 = sbr.rel (!%p19_p2) target bundleno = 6 (0x6), region = 93 }
 0x274   :  { %535 = vsyncpa [#allocation3], 1 }
 0x275   :  { %537 = vsyncpa [#allocation3 + $0x1], 1 }
 0x276   :  { %538 = vsyncpa [#allocation6], 1 }
 0x277   :  { %539 = vsyncpa [#allocation4], 1 }
 0x278   :  { %541 = vsyncpa [#allocation4 + $0x1], 1 }

</bundles_post_ra>
